<compile_context>
chip_gen: v7x
topology: tpu7x:2x2x1
jax: 0.10.0
libtpu: 0.0.40
codegen_flags: <defaults>
</compile_context>

<pallas_src>
import functools

import jax
import jax.numpy as jnp
from jax.experimental import pallas as pl
from jax.experimental.pallas import tpu as pltpu


def _dgcn_cross_kernel(
    ufea_ref,                    # [U, 2F]  = [s_ufea | t_ufea]          (mxu dtype)
    uv_ref,                      # [2U, V]  = [s_UV ; t_UV]              (mxu dtype)
    vu_ref,                      # [2V, U]  = [s_VU ; t_VU]              (mxu dtype)
    w_ref,                       # [4, 2F, 2F] = W12p, W34p, WUho, WUuf  (mxu dtype)
    b_ref,                       # [3, 2F]  = b12p ; b34 ; bu (rate folded)   (f32)
    fold_ref,                    # [2F, F]  = vstack(I_F, I_F)           (mxu dtype)
    out_ref,                     # [U, F]   f32
    *, alpha, hidden_dim,
):
  U, F2 = ufea_ref.shape
  F = F2 // 2
  V = vu_ref.shape[0] // 2
  H = hidden_dim
  cdt = w_ref.dtype              # MXU operand dtype (inputs pre-cast in wrapper)

  def mm(a, b):
    # Pre-cast operands are no-ops here; only the 3 f32 intermediates cast once.
    return jnp.dot(a.astype(cdt), b.astype(cdt),
                   preferred_element_type=jnp.float32)

  def lrelu(x):                  # LeakyReLU(alpha), f32 elementwise
    return jnp.where(x > 0, x, alpha * x)

  ufea = ufea_ref[...]           # [U, 2F]
  uv = uv_ref[...]               # [2U, V]
  vu = vu_ref[...]               # [2V, U]

  b12 = b_ref[0:1, :]            # [1, 2F] = [b1 | b2 | 0]
  b34 = b_ref[1:2, :]            # [1, 2F] = [b3 | b4]
  bu = b_ref[2:3, :]             # [1, 2F] = [r*bsu | (1-r)*btu]

  # --- GCN level 1: one feature push + one stacked-adjacency push ------------
  sup1 = mm(ufea, w_ref[0])                                  # [U, 2F]
  a1 = mm(vu, sup1)                                          # [2V, 2F]
  lane1 = jax.lax.broadcasted_iota(jnp.int32, (V, F2), 1)
  h1 = lrelu(jnp.where(lane1 < H, a1[:V], a1[V:]) + b12)     # [V, 2F] = [gc1 | gc2 | 0]

  # --- GCN level 2 ------------------------------------------------------------
  sup2 = mm(h1, w_ref[1])                                    # [V, 2F]
  a2 = mm(uv, sup2)                                          # [2U, 2F]
  lane2 = jax.lax.broadcasted_iota(jnp.int32, (U, F2), 1)
  ho = lrelu(jnp.where(lane2 < F, a2[:U], a2[U:]) + b34)     # [U, 2F] = [s_ho | t_ho]

  # --- both union Linears, split (no [U,4F] concat); rate folded into weights -
  u = mm(ho, w_ref[2]) + mm(ufea, w_ref[3]) + bu             # [U, 2F] = [r*s_user | (1-r)*t_user]

  # relu(c*x) = c*relu(x) for c >= 0; fold the two halves with one tiny MXU push
  # instead of two sub-vreg lane extracts.
  out_ref[...] = mm(jnp.maximum(u, 0.0), fold_ref[...])      # [U, F]


def dgcn_layer_cross(packed, s_ufea, t_ufea, s_uv, s_vu, t_uv, t_vu, *, leaky):
  """Returns (out, out) exactly like the PyTorch module's forward."""
  U, F = s_ufea.shape
  H = packed["hidden_dim"]
  cdt = packed["wbuf"].dtype

  # One-time wrapper-side packing / casting (single DMA per logical operand).
  ufea = jnp.concatenate([s_ufea, t_ufea], axis=1).astype(cdt)   # [U, 2F]
  uv = jnp.concatenate([s_uv, t_uv], axis=0).astype(cdt)         # [2U, V]
  vu = jnp.concatenate([s_vu, t_vu], axis=0).astype(cdt)         # [2V, U]

  vmem = pl.BlockSpec(memory_space=pltpu.MemorySpace.VMEM)
  out = pl.pallas_call(
      functools.partial(_dgcn_cross_kernel, alpha=leaky, hidden_dim=H),
      out_shape=jax.ShapeDtypeStruct((U, F), jnp.float32),
      in_specs=[vmem] * 6,
      out_specs=vmem,
  )(ufea, uv, vu, packed["wbuf"], packed["bbuf"], packed["fold"])
  return out, out


def make_params(key, feature_dim, hidden_dim):
  """Raw, module-shaped parameters (union Linear stored pre-split/transposed)."""
  ks = jax.random.split(key, 14)
  f, h = feature_dim, hidden_dim

  def w(k, shape, scale=0.1):
    return (scale * jax.random.normal(k, shape)).astype(jnp.float32)

  return {
      "w1": w(ks[0], (f, h)), "b1": w(ks[1], (1, h)),
      "w2": w(ks[2], (f, h)), "b2": w(ks[3], (1, h)),
      "w3": w(ks[4], (h, f)), "b3": w(ks[5], (1, f)),
      "w4": w(ks[6], (h, f)), "b4": w(ks[7], (1, f)),
      "wsu_a": w(ks[8], (f, f)), "wsu_b": w(ks[9], (f, f)), "bsu": w(ks[10], (1, f)),
      "wtu_a": w(ks[11], (f, f)), "wtu_b": w(ks[12], (f, f)), "btu": w(ks[13], (1, f)),
  }


def pack_params(p, rate, *, mxu_dtype=jnp.bfloat16):
  """One-time packing of raw params into the fused kernel operands.

  All per-branch block structure is zero-padded to a uniform [2F, 2F] layout so
  the kernel never needs a lane slice; rate/(1-rate) is folded in f32, then the
  weight buffer is cast to the MXU dtype.  Biases stay f32 (elementwise path).
  """
  assert 0.0 <= float(rate) <= 1.0, "rate must be in [0,1]: relu(c*x)=c*relu(x) needs c>=0"
  f, h = p["w1"].shape
  r = jnp.float32(rate)
  rr = jnp.float32(1.0 - rate)

  W12p = jnp.zeros((2 * f, 2 * f), jnp.float32)
  W12p = W12p.at[:f, :h].set(p["w1"]).at[f:, h:2 * h].set(p["w2"])        # [2F,2F]
  W34p = jnp.zeros((2 * f, 2 * f), jnp.float32)
  W34p = W34p.at[:h, :f].set(p["w3"]).at[h:2 * h, f:].set(p["w4"])        # [2F,2F]
  z = jnp.zeros((f, f), jnp.float32)
  WUho = jnp.block([[r * p["wsu_a"], z], [z, rr * p["wtu_a"]]])           # [2F,2F]
  WUuf = jnp.block([[r * p["wsu_b"], z], [z, rr * p["wtu_b"]]])           # [2F,2F]
  wbuf = jnp.stack([W12p, W34p, WUho, WUuf]).astype(mxu_dtype)            # [4,2F,2F]

  b12 = jnp.concatenate(
      [p["b1"], p["b2"], jnp.zeros((1, 2 * (f - h)), jnp.float32)], axis=1)  # [1,2F]
  b34 = jnp.concatenate([p["b3"], p["b4"]], axis=1)                          # [1,2F]
  bu = jnp.concatenate([r * p["bsu"], rr * p["btu"]], axis=1)                # [1,2F]
  bbuf = jnp.concatenate([b12, b34, bu], axis=0)                             # [3,2F] f32

  eye = jnp.eye(f, dtype=jnp.float32)
  fold = jnp.concatenate([eye, eye], axis=0).astype(mxu_dtype)               # [2F,F]

  return {"wbuf": wbuf, "bbuf": bbuf, "fold": fold, "hidden_dim": h}


def reference_jax(params, s_ufea, t_ufea, s_uv, s_vu, t_uv, t_vu, *, rate, leaky):
  def lrelu(x):
    return jnp.where(x > 0, x, leaky * x)

  def gcn(x, adj, w, b):
    return lrelu(adj @ (x @ w) + b)

  s_ho = gcn(gcn(s_ufea, s_vu, params["w1"], params["b1"]),
             s_uv, params["w3"], params["b3"])
  t_ho = gcn(gcn(t_ufea, t_vu, params["w2"], params["b2"]),
             t_uv, params["w4"], params["b4"])
  s_user = s_ho @ params["wsu_a"] + s_ufea @ params["wsu_b"] + params["bsu"]
  t_user = t_ho @ params["wtu_a"] + t_ufea @ params["wtu_b"] + params["btu"]
  out = rate * jnp.maximum(s_user, 0) + (1 - rate) * jnp.maximum(t_user, 0)
  return out, out


if __name__ == "__main__":
  # Small synthetic shapes implied by the module:
  #   feature_dim F = 32, hidden_dim H = 16, num_users U = 64, num_items V = 48
  U, V, F, H = 64, 48, 32, 16
  RATE, LEAKY = 0.7, 0.2

  key = jax.random.PRNGKey(0)
  k_par, k_sf, k_tf, k1, k2, k3, k4 = jax.random.split(key, 7)

  params = make_params(k_par, F, H)

  s_ufea = jax.random.normal(k_sf, (U, F), dtype=jnp.float32)
  t_ufea = jax.random.normal(k_tf, (U, F), dtype=jnp.float32)
  # dense synthetic (row-normalized) adjacency matrices
  s_uv = jax.nn.softmax(jax.random.normal(k1, (U, V)), axis=-1).astype(jnp.float32)
  s_vu = jax.nn.softmax(jax.random.normal(k2, (V, U)), axis=-1).astype(jnp.float32)
  t_uv = jax.nn.softmax(jax.random.normal(k3, (U, V)), axis=-1).astype(jnp.float32)
  t_vu = jax.nn.softmax(jax.random.normal(k4, (V, U)), axis=-1).astype(jnp.float32)

  with jax.default_matmul_precision("highest"):
    ref1, _ = reference_jax(params, s_ufea, t_ufea, s_uv, s_vu, t_uv, t_vu,
                            rate=RATE, leaky=LEAKY)

  # Default path: bf16 MXU operands on every TPU generation (v5e's MXU is
  # bf16-native too); elementwise math stays f32 in the kernel.
  packed_bf16 = pack_params(params, RATE, mxu_dtype=jnp.bfloat16)
  out1, out2 = dgcn_layer_cross(packed_bf16, s_ufea, t_ufea, s_uv, s_vu, t_uv, t_vu,
                                leaky=LEAKY)
  jax.block_until_ready(out1)
  assert out1.shape == (U, F)
  assert jnp.allclose(out1, ref1, atol=5e-2, rtol=5e-2), "bf16 mismatch vs reference"
  assert jnp.array_equal(out1, out2)

  # f32 MXU operands: high-accuracy mode (use when bit-level fidelity matters).
  packed_f32 = pack_params(params, RATE, mxu_dtype=jnp.float32)
  out_f32, _ = dgcn_layer_cross(packed_f32, s_ufea, t_ufea, s_uv, s_vu, t_uv, t_vu,
                                leaky=LEAKY)
  jax.block_until_ready(out_f32)
  assert jnp.allclose(out_f32, ref1, atol=5e-3, rtol=5e-3), "f32 mismatch vs reference"

  print("KERNEL_OK")
</pallas_src>

<mosaic_0001>
module attributes {stable_mosaic.version = 11 : i64} {
  func.func @_dgcn_cross_kernel(%arg0: memref<64x64xbf16, #tpu.memory_space<vmem>>, %arg1: memref<128x48xbf16, #tpu.memory_space<vmem>>, %arg2: memref<96x64xbf16, #tpu.memory_space<vmem>>, %arg3: memref<4x64x64xbf16, #tpu.memory_space<vmem>>, %arg4: memref<3x64xf32, #tpu.memory_space<vmem>>, %arg5: memref<64x32xbf16, #tpu.memory_space<vmem>>, %arg6: memref<64x32xf32, #tpu.memory_space<vmem>>) attributes {dimension_semantics = [], scalar_prefetch = 0 : i64, scratch_operands = 0 : i64, tpu.core_type = #tpu.core_type<tc>} {
    %c0 = arith.constant 0 : index
    %c0_0 = arith.constant 0 : index
    %0 = vector.load %arg0[%c0, %c0_0] : memref<64x64xbf16, #tpu.memory_space<vmem>>, vector<64x64xbf16>
    %c0_1 = arith.constant 0 : index
    %c0_2 = arith.constant 0 : index
    %1 = vector.load %arg1[%c0_1, %c0_2] : memref<128x48xbf16, #tpu.memory_space<vmem>>, vector<128x48xbf16>
    %c0_3 = arith.constant 0 : index
    %c0_4 = arith.constant 0 : index
    %2 = vector.load %arg2[%c0_3, %c0_4] : memref<96x64xbf16, #tpu.memory_space<vmem>>, vector<96x64xbf16>
    %c0_5 = arith.constant 0 : index
    %c0_6 = arith.constant 0 : index
    %3 = vector.load %arg4[%c0_5, %c0_6] : memref<3x64xf32, #tpu.memory_space<vmem>>, vector<1x64xf32>
    %c1 = arith.constant 1 : index
    %c0_7 = arith.constant 0 : index
    %4 = vector.load %arg4[%c1, %c0_7] : memref<3x64xf32, #tpu.memory_space<vmem>>, vector<1x64xf32>
    %c2 = arith.constant 2 : index
    %c0_8 = arith.constant 0 : index
    %5 = vector.load %arg4[%c2, %c0_8] : memref<3x64xf32, #tpu.memory_space<vmem>>, vector<1x64xf32>
    %c0_9 = arith.constant 0 : index
    %c0_10 = arith.constant 0 : index
    %c0_11 = arith.constant 0 : index
    %6 = vector.load %arg3[%c0_9, %c0_10, %c0_11] : memref<4x64x64xbf16, #tpu.memory_space<vmem>>, vector<1x64x64xbf16>
    %7 = vector.shape_cast %6 : vector<1x64x64xbf16> to vector<64x64xbf16>
    %cst = arith.constant dense<0.000000e+00> : vector<64x64xf32>
    %8 = tpu.matmul %0, %7, %cst {dimension_numbers = #tpu.dot_dimension_numbers<[1], [0], [0], [1], [0, 0, 1, 1], [], []>} : vector<64x64xbf16>, vector<64x64xbf16>, vector<64x64xf32> -> vector<64x64xf32>
    %9 = arith.truncf %8 : vector<64x64xf32> to vector<64x64xbf16>
    %cst_12 = arith.constant dense<0.000000e+00> : vector<96x64xf32>
    %10 = tpu.matmul %2, %9, %cst_12 {dimension_numbers = #tpu.dot_dimension_numbers<[1], [0], [0], [1], [0, 0, 1, 1], [], []>} : vector<96x64xbf16>, vector<64x64xbf16>, vector<96x64xf32> -> vector<96x64xf32>
    %11 = tpu.iota {dimensions = array<i32: 1>} : vector<48x64xi32>
    %c16_i32 = arith.constant 16 : i32
    %12 = vector.broadcast %c16_i32 : i32 to vector<48x64xi32>
    %13 = arith.cmpi slt, %11, %12 : vector<48x64xi32>
    %14 = vector.extract_strided_slice %10 {offsets = [0, 0], sizes = [48, 64], strides = [1, 1]} : vector<96x64xf32> to vector<48x64xf32>
    %15 = vector.extract_strided_slice %10 {offsets = [48, 0], sizes = [48, 64], strides = [1, 1]} : vector<96x64xf32> to vector<48x64xf32>
    %16 = arith.select %13, %14, %15 : vector<48x64xi1>, vector<48x64xf32>
    %17 = vector.broadcast %3 : vector<1x64xf32> to vector<48x64xf32>
    %18 = arith.addf %16, %17 : vector<48x64xf32>
    %cst_13 = arith.constant 0.000000e+00 : f32
    %19 = vector.broadcast %cst_13 : f32 to vector<48x64xf32>
    %20 = arith.cmpf ogt, %18, %19 : vector<48x64xf32>
    %cst_14 = arith.constant 2.000000e-01 : f32
    %21 = vector.broadcast %cst_14 : f32 to vector<48x64xf32>
    %22 = arith.mulf %21, %18 : vector<48x64xf32>
    %23 = arith.select %20, %18, %22 : vector<48x64xi1>, vector<48x64xf32>
    %c1_15 = arith.constant 1 : index
    %c0_16 = arith.constant 0 : index
    %c0_17 = arith.constant 0 : index
    %24 = vector.load %arg3[%c1_15, %c0_16, %c0_17] : memref<4x64x64xbf16, #tpu.memory_space<vmem>>, vector<1x64x64xbf16>
    %25 = vector.shape_cast %24 : vector<1x64x64xbf16> to vector<64x64xbf16>
    %26 = arith.truncf %23 : vector<48x64xf32> to vector<48x64xbf16>
    %cst_18 = arith.constant dense<0.000000e+00> : vector<48x64xf32>
    %27 = tpu.matmul %26, %25, %cst_18 {dimension_numbers = #tpu.dot_dimension_numbers<[1], [0], [0], [1], [0, 0, 1, 1], [], []>} : vector<48x64xbf16>, vector<64x64xbf16>, vector<48x64xf32> -> vector<48x64xf32>
    %28 = arith.truncf %27 : vector<48x64xf32> to vector<48x64xbf16>
    %cst_19 = arith.constant dense<0.000000e+00> : vector<128x64xf32>
    %29 = tpu.matmul %1, %28, %cst_19 {dimension_numbers = #tpu.dot_dimension_numbers<[1], [0], [0], [1], [0, 0, 1, 1], [], []>} : vector<128x48xbf16>, vector<48x64xbf16>, vector<128x64xf32> -> vector<128x64xf32>
    %30 = tpu.iota {dimensions = array<i32: 1>} : vector<64x64xi32>
    %c32_i32 = arith.constant 32 : i32
    %31 = vector.broadcast %c32_i32 : i32 to vector<64x64xi32>
    %32 = arith.cmpi slt, %30, %31 : vector<64x64xi32>
    %33 = vector.extract_strided_slice %29 {offsets = [0, 0], sizes = [64, 64], strides = [1, 1]} : vector<128x64xf32> to vector<64x64xf32>
    %34 = vector.extract_strided_slice %29 {offsets = [64, 0], sizes = [64, 64], strides = [1, 1]} : vector<128x64xf32> to vector<64x64xf32>
    %35 = arith.select %32, %33, %34 : vector<64x64xi1>, vector<64x64xf32>
    %36 = vector.broadcast %4 : vector<1x64xf32> to vector<64x64xf32>
    %37 = arith.addf %35, %36 : vector<64x64xf32>
    %cst_20 = arith.constant 0.000000e+00 : f32
    %38 = vector.broadcast %cst_20 : f32 to vector<64x64xf32>
    %39 = arith.cmpf ogt, %37, %38 : vector<64x64xf32>
    %cst_21 = arith.constant 2.000000e-01 : f32
    %40 = vector.broadcast %cst_21 : f32 to vector<64x64xf32>
    %41 = arith.mulf %40, %37 : vector<64x64xf32>
    %42 = arith.select %39, %37, %41 : vector<64x64xi1>, vector<64x64xf32>
    %c2_22 = arith.constant 2 : index
    %c0_23 = arith.constant 0 : index
    %c0_24 = arith.constant 0 : index
    %43 = vector.load %arg3[%c2_22, %c0_23, %c0_24] : memref<4x64x64xbf16, #tpu.memory_space<vmem>>, vector<1x64x64xbf16>
    %44 = vector.shape_cast %43 : vector<1x64x64xbf16> to vector<64x64xbf16>
    %45 = arith.truncf %42 : vector<64x64xf32> to vector<64x64xbf16>
    %cst_25 = arith.constant dense<0.000000e+00> : vector<64x64xf32>
    %46 = tpu.matmul %45, %44, %cst_25 {dimension_numbers = #tpu.dot_dimension_numbers<[1], [0], [0], [1], [0, 0, 1, 1], [], []>} : vector<64x64xbf16>, vector<64x64xbf16>, vector<64x64xf32> -> vector<64x64xf32>
    %c3 = arith.constant 3 : index
    %c0_26 = arith.constant 0 : index
    %c0_27 = arith.constant 0 : index
    %47 = vector.load %arg3[%c3, %c0_26, %c0_27] : memref<4x64x64xbf16, #tpu.memory_space<vmem>>, vector<1x64x64xbf16>
    %48 = vector.shape_cast %47 : vector<1x64x64xbf16> to vector<64x64xbf16>
    %cst_28 = arith.constant dense<0.000000e+00> : vector<64x64xf32>
    %49 = tpu.matmul %0, %48, %cst_28 {dimension_numbers = #tpu.dot_dimension_numbers<[1], [0], [0], [1], [0, 0, 1, 1], [], []>} : vector<64x64xbf16>, vector<64x64xbf16>, vector<64x64xf32> -> vector<64x64xf32>
    %50 = arith.addf %46, %49 : vector<64x64xf32>
    %51 = vector.broadcast %5 : vector<1x64xf32> to vector<64x64xf32>
    %52 = arith.addf %50, %51 : vector<64x64xf32>
    %cst_29 = arith.constant 0.000000e+00 : f32
    %53 = vector.broadcast %cst_29 : f32 to vector<64x64xf32>
    %54 = arith.maximumf %52, %53 : vector<64x64xf32>
    %c0_30 = arith.constant 0 : index
    %c0_31 = arith.constant 0 : index
    %55 = vector.load %arg5[%c0_30, %c0_31] : memref<64x32xbf16, #tpu.memory_space<vmem>>, vector<64x32xbf16>
    %56 = arith.truncf %54 : vector<64x64xf32> to vector<64x64xbf16>
    %cst_32 = arith.constant dense<0.000000e+00> : vector<64x32xf32>
    %57 = tpu.matmul %56, %55, %cst_32 {dimension_numbers = #tpu.dot_dimension_numbers<[1], [0], [0], [1], [0, 0, 1, 1], [], []>} : vector<64x64xbf16>, vector<64x32xbf16>, vector<64x32xf32> -> vector<64x32xf32>
    %c0_33 = arith.constant 0 : index
    %c0_34 = arith.constant 0 : index
    %58 = vector.load %arg6[%c0_33, %c0_34] : memref<64x32xf32, #tpu.memory_space<vmem>>, vector<64x32xf32>
    tpu.vector_store %arg6[%c0_33, %c0_34], %57 {strides = array<i32>} : memref<64x32xf32, #tpu.memory_space<vmem>>, vector<64x32xf32>,
    return
  }
}

</mosaic_0001>

<bundles_post_ra>
// kernel: tpu_custom_call.1
= control target key start
LH: loop header
LB: loop body
LE: loop exit
PB: predicated region body
PF: predicated region fallthrough
CT: control target
= control target key end

     0   :  { %vm115_vm0 = vcmask 523264   ;;  %v1365_v27 = vmov 0.0   ;;  %vm1366_vm1 = vmmov 0   ;;  %v326_v31 = vlaneseq  ;;  %s1648_s3 = inlined_call_operand.vmem [shape: bf16[4,64,64], index: 3, kind: input, shape index: {}]   ;;  %s1649_s0 = inlined_call_operand.vmem [shape: bf16[64,64], index: 0, kind: input, shape index: {}]   ;;  %s1650_s2 = inlined_call_operand.vmem [shape: bf16[96,64], index: 2, kind: input, shape index: {}]   ;;  %s1651_s4 = inlined_call_operand.vmem [shape: f32[3,64], index: 4, kind: input, shape index: {}]   ;;  %s1652_s1 = inlined_call_operand.vmem [shape: bf16[128,48], index: 1, kind: input, shape index: {}]   ;;  %s1653_s5 = inlined_call_operand.vmem [shape: bf16[64,32], index: 5, kind: input, shape index: {}]   ;;  %s1654_s6 = inlined_call_operand.vmem [shape: f32[64,32], index: 6, kind: output, shape index: {}]  }
   0x1   :  { %v1327_v0 = vld [vmem:[%s1648_s3] sm:$0xff]   ;;  %v1328_v1 = vld [vmem:[%s1648_s3 + $0x8] sm:$0xff]   ;;  %v1329_v2 = vld [vmem:[%s1648_s3 + $0x10] sm:$0xff]   ;;  %vm508_vm9 = vcmask 392192  }
   0x2   :  { %1191 = vmatprep.subr.bf16.mxu0 %v1327_v0  ;;  %v1414_v3 = vld [vmem:[%s1649_s0] sm:$0xff]   ;;  %v1330_v4 = vld [vmem:[%s1648_s3 + $0x18] sm:$0xff]   ;;  %v1424_v5 = vld [vmem:[%s1649_s0 + $0x8] sm:$0xff]   ;;  %v1484_v35 = vand.u32 127, %v326_v31 }
   0x3   :  { %1192 = vmatpush3.bf16.msra.mxu0 %v1327_v0  ;;  %1199 = vmatprep.mubr.msk.bf16.mxu0 %vm115_vm0, %v1414_v3  ;;  %v1429_v6 = vld [vmem:[%s1649_s0 + $0x10] sm:$0xff]   ;;  %v1438_v7 = vld [vmem:[%s1649_s0 + $0x18] sm:$0xff]   ;;  %v1335_v8 = vld [vmem:[%s1650_s2] sm:$0xff]  }
   0x4   :  { %1193 = vmatprep.subr.bf16.mxu0 %v1328_v1  ;;  %1215 = vmatprep.mubr.msk.bf16.mxu1 %vm115_vm0, %v1335_v8  ;;  %v1336_v21 = vld [vmem:[%s1650_s2 + $0x8] sm:$0xff]   ;;  %v1337_v22 = vld [vmem:[%s1650_s2 + $0x10] sm:$0xff]   ;;  %v1338_v23 = vld [vmem:[%s1650_s2 + $0x18] sm:$0xff]   ;;  %vm328_vm2 = vcmp.lt.s32.totalorder %v1484_v35, 16  ;;  %vm630_vm10 = vcmp.lt.s32.totalorder %v1484_v35, 32 }
   0x5   :  { %v1339_v24 = vld [vmem:[%s1650_s2 + $0x20] sm:$0xff]   ;;  %v1340_v25 = vld [vmem:[%s1650_s2 + $0x28] sm:$0xff]   ;;  %v1343_v29 = vld [vmem:[%s1648_s3 + $0x30] sm:$0xff]  }
   0x6   :  { %v1341_v26 = vld [vmem:[%s1648_s3 + $0x20] sm:$0xff]   ;;  %v1342_v28 = vld [vmem:[%s1648_s3 + $0x28] sm:$0xff]   ;;  %v1344_v30 = vld [vmem:[%s1648_s3 + $0x38] sm:$0xff]  }
   0x7   :  { %1194 = vmatpush3.bf16.msra.mxu0 %v1328_v1  ;;  %v1057_v37 = vld [vmem:[%s1651_s4] ss:$0 sm:$0xff]  ;;  %v1347_v31 = vld [vmem:[%s1652_s1 + $0x10] sm:$0xff]   ;;  %v1364_v35 = vld [vmem:[%s1653_s5 + $0x18] sm:$0xff]  }
   0x8   :  { %1195 = vmatprep.subr.bf16.mxu0 %v1329_v2 }
   0xb   :  { %1196 = vmatpush3.bf16.msra.mxu0 %v1329_v2 }
   0xc   :  { %1197 = vmatprep.subr.bf16.mxu0 %v1330_v4 }
   0xf   :  { %1198 = vmatpush3.bf16.msra.mxu0 %v1330_v4 }
  0x10   :  { %1227 = vmatprep.subr.bf16.mxu0 %v1365_v27 }
  0x12   :  { %1200 = vmatmul.mubr.msk.bf16.vlgmr.msra.gmra.mrb[0].mxu0 %vm115_vm0, %v1424_v5 }
  0x13   :  { %1203 = vmatprep.mubr.msk.bf16.mxu0 %vm115_vm0, %v1429_v6  ;;  %1228 = vmatpush3.bf16.msra.mxu0 %v1341_v26 }
  0x14   :  { %1229 = vmatprep.subr.bf16.mxu0 %v1365_v27 }
  0x17   :  { %1230 = vmatpush3.bf16.msra.mxu0 %v1342_v28 }
  0x18   :  { %1231 = vmatprep.subr.bf16.mxu0 %v1365_v27 }
  0x1a   :  { %1204 = vmatmul.mubr.msk.bf16.gmra.mrb[4].mxu0 %vm115_vm0, %v1438_v7 }
  0x1b   :  { %1232 = vmatpush3.bf16.msra.mxu0 %v1343_v29  ;;  %1235 = vmatprep.mubr.msk.bf16.mxu0 %vm1366_vm1, %v1365_v27 }
  0x1c   :  { %1233 = vmatprep.subr.bf16.mxu0 %v1365_v27 }
  0x1f   :  { %1234 = vmatpush3.bf16.msra.mxu0 %v1344_v30  ;;  %v1346_v30 = vld [vmem:[%s1652_s1 + $0x8] sm:$0xff]  }
  0xe5   :  { %v1201_v9 = vpop.f32.mrb[0].mxu0 }
  0xe6   :  { %v162_v10 = vpop.f32.mrb[1].mxu0 }
  0xe7   :  { %v1202_v11 = vpop.f32.mrb[2].mxu0 }
  0xe8   :  { %v194_v12 = vpack.c.bf16 %v1202_v11, %v1201_v9  ;;  %v165_v13 = vpop.f32.mrb[3].mxu0 }
  0xe9   :  { %v193_v14 = vpack.c.bf16 %v165_v13, %v162_v10  ;;  %v1345_v13 = vld [vmem:[%s1652_s1] sm:$0xff]  }
  0xeb   :  { %1207 = vmatprep.subr.bf16.mxu1 %v193_v14 }
  0xec   :  { %1208 = vmatpush3.bf16.msra.mxu1 %v193_v14  ;;  %v1353_v14 = vld [vmem:[%s1648_s3 + $0x60] sm:$0xff]  }
  0xed   :  { %v1205_v15 = vpop.f32.mrb[4].mxu0  ;;  %1209 = vmatprep.subr.bf16.mxu1 %v194_v12  ;;  %1269 = vmatprep.subr.bf16.mxu0 %v1353_v14 }
  0xee   :  { %v178_v16 = vpop.f32.mrb[5].mxu0 }
  0xef   :  { %v1206_v17 = vpop.f32.mrb[6].mxu0 }
  0xf0   :  { %v196_v18 = vpack.c.bf16 %v1206_v17, %v1205_v15  ;;  %v181_v19 = vpop.f32.mrb[7].mxu0  ;;  %1210 = vmatpush3.bf16.msra.mxu1 %v194_v12  ;;  %v1354_v15 = vld [vmem:[%s1648_s3 + $0x68] sm:$0xff]  }
  0xf1   :  { %v195_v20 = vpack.c.bf16 %v181_v19, %v178_v16 }
  0xf3   :  { %1211 = vmatprep.subr.bf16.mxu1 %v195_v20 }
  0xf4   :  { %1212 = vmatpush3.bf16.msra.mxu1 %v195_v20 }
  0xf5   :  { %1213 = vmatprep.subr.bf16.mxu1 %v196_v18 }
  0xf8   :  { %1214 = vmatpush3.bf16.msra.mxu1 %v196_v18 }
  0xfb   :  { %1216 = vmatmul.mubr.msk.bf16.vlgmr.msra.gmra.mrb[0].mxu1 %vm115_vm0, %v1336_v21 }
  0xfc   :  { %1219 = vmatprep.mubr.msk.bf16.mxu1 %vm115_vm0, %v1337_v22 }
 0x103   :  { %1220 = vmatmul.mubr.msk.bf16.gmra.mrb[4].mxu1 %vm115_vm0, %v1338_v23 }
 0x104   :  { %1223 = vmatprep.mubr.msk.bf16.mxu1 %vm115_vm0, %v1339_v24 }
 0x10b   :  { %1224 = vmatmul.mubr.msk.bf16.gmra.mrb[8].mxu1 %vm115_vm0, %v1340_v25 }
 0x10c   :  { %1253 = vmatprep.mubr.msk.bf16.mxu1 %vm508_vm9, %v1345_v13 }
 0x1ce   :  { %v1217_v32 = vpop.f32.mrb[0].mxu1 }
 0x1cf   :  { %v279_v33 = vpop.f32.mrb[1].mxu1 }
 0x1d0   :  { %v1218_v34 = vpop.f32.mrb[2].mxu1 }
 0x1d1   :  { %v282_v36 = vpop.f32.mrb[3].mxu1 }
 0x1d6   :  { %v1221_v38 = vpop.f32.mrb[4].mxu1 }
 0x1d7   :  { %v329_v39 = vsel %vm328_vm2, %v279_v33, %v1221_v38  ;;  %v295_v40 = vpop.f32.mrb[5].mxu1  ;;  %v1349_v33 = vld [vmem:[%s1652_s1 + $0x20] sm:$0xff]   ;;  %v1355_v38 = vld [vmem:[%s1648_s3 + $0x70] sm:$0xff]  }
 0x1d8   :  { %v339_v41 = vadd.f32 %v1057_v37, %v329_v39  ;;  %v1222_v42 = vpop.f32.mrb[6].mxu1  ;;  %v1356_v39 = vld [vmem:[%s1648_s3 + $0x78] sm:$0xff]  }
 0x1d9   :  { %v330_v43 = vsel %vm328_vm2, %v282_v36, %v1222_v42  ;;  %v298_v44 = vpop.f32.mrb[7].mxu1  ;;  %v1351_v36 = vld [vmem:[%s1652_s1 + $0x30] sm:$0xff]  }
 0x1da   :  { %v351_v45 = vmul.f32 0.2, %v339_v41  ;;  %v340_v46 = vadd.f32 %v1057_v37, %v330_v43  ;;  %vm345_vm3 = vcmp.gt.f32.partialorder %v339_v41, 0.0  ;;  %v1359_v42 = vld [vmem:[%s1648_s3 + $0x50] sm:$0xff]   ;;  %v1362_v43 = vld [vmem:[%s1653_s5 + $0x8] sm:$0xff]  }
 0x1dc   :  { %vm346_vm4 = vcmp.gt.f32.partialorder %v340_v46, 0.0  ;;  %v352_v47 = vmul.f32 0.2, %v340_v46  ;;  %v357_v48 = vsel %vm345_vm3, %v339_v41, %v351_v45  ;;  %v1358_v41 = vld [vmem:[%s1648_s3 + $0x48] sm:$0xff]  }
 0x1de   :  { %v358_v49 = vsel %vm346_vm4, %v340_v46, %v352_v47  ;;  %v1225_v50 = vpop.f32.mrb[8].mxu1  ;;  %vm1020_vm4 = vcmask 261120  }
 0x1df   :  { %v372_v51 = vpack.c.bf16 %v358_v49, %v357_v48  ;;  %v333_v52 = vsel %vm328_vm2, %v295_v40, %v1225_v50  ;;  %v311_v53 = vpop.f32.mrb[9].mxu1  ;;  %v1357_v40 = vld [vmem:[%s1648_s3 + $0x40] sm:$0xff]  }
 0x1e0   :  { %v343_v54 = vadd.f32 %v1057_v37, %v333_v52  ;;  %v331_v55 = vsel %vm328_vm2, %v1217_v32, %v311_v53  ;;  %v1226_v56 = vpop.f32.mrb[10].mxu1  ;;  %v1348_v32 = vld [vmem:[%s1652_s1 + $0x18] sm:$0xff]   ;;  %v1089_v52 = vld [vmem:[%s1651_s4 + $0x1] ss:$0 sm:$0xff] }
 0x1e1   :  { %v341_v57 = vadd.f32 %v1057_v37, %v331_v55  ;;  %v334_v58 = vsel %vm328_vm2, %v298_v44, %v1226_v56  ;;  %v314_v59 = vpop.f32.mrb[11].mxu1  ;;  %1236 = vmatmul.mubr.msk.bf16.vlgmr.msra.gmra.mrb[8].mxu0 %vm115_vm0, %v372_v51 }
 0x1e2   :  { %v355_v60 = vmul.f32 0.2, %v343_v54  ;;  %v344_v61 = vadd.f32 %v1057_v37, %v334_v58  ;;  %v332_v62 = vsel %vm328_vm2, %v1218_v34, %v314_v59  ;;  %1239 = vmatprep.mubr.msk.bf16.mxu0 %vm1366_vm1, %v1365_v27  ;;  %vm349_vm5 = vcmp.gt.f32.partialorder %v343_v54, 0.0  ;;  %1270 = vmatpush3.bf16.msra.mxu0 %v1353_v14  ;;  %v1350_v34 = vld [vmem:[%s1652_s1 + $0x28] sm:$0xff]  }
 0x1e3   :  { %v353_v63 = vmul.f32 0.2, %v341_v57  ;;  %v342_v0 = vadd.f32 %v1057_v37, %v332_v62  ;;  %vm347_vm6 = vcmp.gt.f32.partialorder %v341_v57, 0.0  ;;  %1271 = vmatprep.subr.bf16.mxu0 %v1354_v15  ;;  %v1352_v37 = vld [vmem:[%s1652_s1 + $0x38] sm:$0xff]  }
 0x1e4   :  { %vm350_vm7 = vcmp.gt.f32.partialorder %v344_v61, 0.0  ;;  %v356_v1 = vmul.f32 0.2, %v344_v61  ;;  %v361_v4 = vsel %vm349_vm5, %v343_v54, %v355_v60 }
 0x1e5   :  { %vm348_vm8 = vcmp.gt.f32.partialorder %v342_v0, 0.0  ;;  %v354_v2 = vmul.f32 0.2, %v342_v0  ;;  %v359_v9 = vsel %vm347_vm6, %v341_v57, %v353_v63 }
 0x1e6   :  { %v362_v8 = vsel %vm350_vm7, %v344_v61, %v356_v1  ;;  %1272 = vmatpush3.bf16.msra.mxu0 %v1354_v15 }
 0x1e7   :  { %v360_v10 = vsel %vm348_vm8, %v342_v0, %v354_v2  ;;  %v374_v11 = vpack.c.bf16 %v362_v8, %v361_v4  ;;  %1273 = vmatprep.subr.bf16.mxu0 %v1355_v38 }
 0x1e8   :  { %v373_v12 = vpack.c.bf16 %v360_v10, %v359_v9 }
 0x1ea   :  { %1240 = vmatmul.mubr.msk.bf16.gmra.mrb[12].mxu0 %vm115_vm0, %v373_v12 }
 0x1eb   :  { %1243 = vmatprep.mubr.msk.bf16.mxu0 %vm1366_vm1, %v1365_v27  ;;  %1274 = vmatpush3.bf16.msra.mxu0 %v1355_v38 }
 0x1ec   :  { %1275 = vmatprep.subr.bf16.mxu0 %v1356_v39 }
 0x1ef   :  { %1276 = vmatpush3.bf16.msra.mxu0 %v1356_v39 }
 0x1f0   :  { %1285 = vmatprep.subr.bf16.mxu0 %v1357_v40 }
 0x1f2   :  { %1244 = vmatmul.mubr.msk.bf16.gmra.mrb[16].mxu0 %vm115_vm0, %v374_v11 }
 0x1f3   :  { %1277 = vmatprep.mubr.msk.bf16.mxu0 %vm115_vm0, %v1414_v3 }
 0x1fa   :  { %1278 = vmatmul.mubr.msk.bf16.vlgmr.msra.gmra.mrb[20].mxu0 %vm115_vm0, %v1424_v5  ;;  %v1360_v5 = vld [vmem:[%s1648_s3 + $0x58] sm:$0xff]  }
 0x1fb   :  { %1286 = vmatpush3.bf16.msra.mxu0 %v1357_v40  ;;  %1281 = vmatprep.mubr.msk.bf16.mxu0 %vm115_vm0, %v1429_v6  ;;  %v1361_v6 = vld [vmem:[%s1653_s5] sm:$0xff]  }
 0x1fc   :  { %1287 = vmatprep.subr.bf16.mxu0 %v1358_v41 }
 0x1ff   :  { %1288 = vmatpush3.bf16.msra.mxu0 %v1358_v41 }
 0x200   :  { %1289 = vmatprep.subr.bf16.mxu0 %v1359_v42 }
 0x202   :  { %1282 = vmatmul.mubr.msk.bf16.gmra.mrb[24].mxu0 %vm115_vm0, %v1438_v7  ;;  %v1363_v7 = vld [vmem:[%s1653_s5 + $0x10] sm:$0xff]  }
 0x203   :  { %1290 = vmatpush3.bf16.msra.mxu0 %v1359_v42 }
 0x204   :  { %1291 = vmatprep.subr.bf16.mxu0 %v1360_v5 }
 0x207   :  { %1292 = vmatpush3.bf16.msra.mxu0 %v1360_v5 }
 0x2b4   :  { %v442_v3 = vpop.f32.mrb[8].mxu0 }
 0x2b5   :  { %v1237_v16 = vpop.f32.mrb[9].mxu0 }
 0x2b6   :  { %v445_v17 = vpop.f32.mrb[10].mxu0 }
 0x2b7   :  { %v465_v18 = vpack.c.bf16 %v445_v17, %v442_v3  ;;  %v1238_v19 = vpop.f32.mrb[11].mxu0 }
 0x2b9   :  { %1247 = vmatprep.subr.bf16.mxu1 %v465_v18 }
 0x2ba   :  { %1248 = vmatpush3.bf16.msra.mxu1 %v465_v18 }
 0x2bd   :  { %v450_v20 = vpop.f32.mrb[12].mxu0 }
 0x2be   :  { %v1241_v21 = vpop.f32.mrb[13].mxu0 }
 0x2bf   :  { %v453_v22 = vpop.f32.mrb[14].mxu0 }
 0x2c0   :  { %v466_v23 = vpack.c.bf16 %v453_v22, %v450_v20  ;;  %v1242_v24 = vpop.f32.mrb[15].mxu0 }
 0x2c2   :  { %1249 = vmatprep.subr.bf16.mxu1 %v466_v23 }
 0x2c3   :  { %1250 = vmatpush3.bf16.msra.mxu1 %v466_v23 }
 0x2c5   :  { %v458_v25 = vpop.f32.mrb[16].mxu0 }
 0x2c6   :  { %v1245_v26 = vpop.f32.mrb[17].mxu0 }
 0x2c7   :  { %v461_v27 = vpop.f32.mrb[18].mxu0 }
 0x2c8   :  { %v467_v28 = vpack.c.bf16 %v461_v27, %v458_v25  ;;  %v1246_v29 = vpop.f32.mrb[19].mxu0 }
 0x2ca   :  { %1251 = vmatprep.subr.bf16.mxu1 %v467_v28 }
 0x2cb   :  { %1252 = vmatpush3.bf16.msra.mxu1 %v467_v28 }
 0x2cc   :  { %1301 = vmatprep.subr.bf16.mxu1 %v1361_v6 }
 0x2ce   :  { %1254 = vmatmul.mubr.msk.bf16.vlgmr.msra.gmra.mrb[12].mxu1 %vm508_vm9, %v1346_v30 }
 0x2cf   :  { %1257 = vmatprep.mubr.msk.bf16.mxu1 %vm508_vm9, %v1347_v31  ;;  %1302 = vmatpush3.bf16.msra.mxu1 %v1361_v6 }
 0x2d0   :  { %1303 = vmatprep.subr.bf16.mxu1 %v1362_v43 }
 0x2d3   :  { %1304 = vmatpush3.bf16.msra.mxu1 %v1362_v43 }
 0x2d4   :  { %1305 = vmatprep.subr.bf16.mxu1 %v1363_v7 }
 0x2d6   :  { %1258 = vmatmul.mubr.msk.bf16.gmra.mrb[16].mxu1 %vm508_vm9, %v1348_v32 }
 0x2d7   :  { %1261 = vmatprep.mubr.msk.bf16.mxu1 %vm508_vm9, %v1349_v33  ;;  %1306 = vmatpush3.bf16.msra.mxu1 %v1363_v7 }
 0x2d8   :  { %1307 = vmatprep.subr.bf16.mxu1 %v1364_v35 }
 0x2db   :  { %1308 = vmatpush3.bf16.msra.mxu1 %v1364_v35 }
 0x2de   :  { %1262 = vmatmul.mubr.msk.bf16.gmra.mrb[20].mxu1 %vm508_vm9, %v1350_v34 }
 0x2df   :  { %1265 = vmatprep.mubr.msk.bf16.mxu1 %vm508_vm9, %v1351_v36 }
 0x2e6   :  { %1266 = vmatmul.mubr.msk.bf16.gmra.mrb[24].mxu1 %vm508_vm9, %v1352_v37  ;;  %v1122_v37 = vld [vmem:[%s1651_s4 + $0x2] ss:$0 sm:$0xff] }
 0x3a1   :  { %v1255_v44 = vpop.f32.mrb[12].mxu1 }
 0x3a2   :  { %v567_v45 = vpop.f32.mrb[13].mxu1 }
 0x3a3   :  { %v1256_v46 = vpop.f32.mrb[14].mxu1 }
 0x3a4   :  { %v570_v47 = vpop.f32.mrb[15].mxu1 }
 0x3a9   :  { %v1259_v48 = vpop.f32.mrb[16].mxu1 }
 0x3aa   :  { %v583_v49 = vpop.f32.mrb[17].mxu1 }
 0x3ab   :  { %v1260_v50 = vpop.f32.mrb[18].mxu1 }
 0x3ac   :  { %v586_v51 = vpop.f32.mrb[19].mxu1 }
 0x3b1   :  { %v1263_v53 = vpop.f32.mrb[20].mxu1 }
 0x3b2   :  { %v633_v54 = vsel %vm630_vm10, %v1255_v44, %v1263_v53  ;;  %v599_v55 = vpop.f32.mrb[21].mxu1 }
 0x3b3   :  { %v645_v56 = vadd.f32 %v1089_v52, %v633_v54  ;;  %v631_v57 = vsel %vm630_vm10, %v567_v45, %v599_v55  ;;  %v1264_v58 = vpop.f32.mrb[22].mxu1 }
 0x3b4   :  { %v643_v59 = vadd.f32 %v1089_v52, %v631_v57  ;;  %v634_v60 = vsel %vm630_vm10, %v1256_v46, %v1264_v58  ;;  %v602_v61 = vpop.f32.mrb[23].mxu1 }
 0x3b5   :  { %v661_v62 = vmul.f32 0.2, %v645_v56  ;;  %v646_v63 = vadd.f32 %v1089_v52, %v634_v60  ;;  %v632_v0 = vsel %vm630_vm10, %v570_v47, %v602_v61  ;;  %vm653_vm11 = vcmp.gt.f32.partialorder %v645_v56, 0.0 }
 0x3b6   :  { %v659_v1 = vmul.f32 0.2, %v643_v59  ;;  %v644_v2 = vadd.f32 %v1089_v52, %v632_v0  ;;  %vm651_vm12 = vcmp.gt.f32.partialorder %v643_v59, 0.0 }
 0x3b7   :  { %vm654_vm13 = vcmp.gt.f32.partialorder %v646_v63, 0.0  ;;  %v662_v4 = vmul.f32 0.2, %v646_v63  ;;  %v669_v9 = vsel %vm653_vm11, %v645_v56, %v661_v62 }
 0x3b8   :  { %vm652_vm14 = vcmp.gt.f32.partialorder %v644_v2, 0.0  ;;  %v660_v8 = vmul.f32 0.2, %v644_v2  ;;  %v667_v12 = vsel %vm651_vm12, %v643_v59, %v659_v1 }
 0x3b9   :  { %v670_v10 = vsel %vm654_vm13, %v646_v63, %v662_v4  ;;  %v1267_v11 = vpop.f32.mrb[24].mxu1 }
 0x3ba   :  { %v685_v13 = vpack.c.bf16 %v670_v10, %v669_v9  ;;  %v668_v14 = vsel %vm652_vm14, %v644_v2, %v660_v8  ;;  %v637_v15 = vsel %vm630_vm10, %v1259_v48, %v1267_v11  ;;  %v615_v3 = vpop.f32.mrb[25].mxu1 }
 0x3bb   :  { %v649_v16 = vadd.f32 %v1089_v52, %v637_v15  ;;  %v635_v17 = vsel %vm630_vm10, %v583_v49, %v615_v3  ;;  %v1268_v18 = vpop.f32.mrb[26].mxu1  ;;  %v684_v19 = vpack.c.bf16 %v668_v14, %v667_v12 }
 0x3bc   :  { %v647_v20 = vadd.f32 %v1089_v52, %v635_v17  ;;  %v638_v21 = vsel %vm630_vm10, %v1260_v50, %v1268_v18  ;;  %v618_v22 = vpop.f32.mrb[27].mxu1 }
 0x3bd   :  { %v665_v23 = vmul.f32 0.2, %v649_v16  ;;  %v650_v24 = vadd.f32 %v1089_v52, %v638_v21  ;;  %v636_v25 = vsel %vm630_vm10, %v586_v51, %v618_v22  ;;  %1293 = vmatprep.mubr.msk.bf16.mxu0 %vm115_vm0, %v684_v19  ;;  %vm657_vm15 = vcmp.gt.f32.partialorder %v649_v16, 0.0 }
 0x3be   :  { %v663_v26 = vmul.f32 0.2, %v647_v20  ;;  %v648_v27 = vadd.f32 %v1089_v52, %v636_v25  ;;  %1294 = vmatmul.mubr.msk.bf16.vlgmr.msra.gmra.mrb[20].mxu0 %vm115_vm0, %v685_v13  ;;  %vm655_vm1 = vcmp.gt.f32.partialorder %v647_v20, 0.0 }
 0x3bf   :  { %vm658_vm2 = vcmp.gt.f32.partialorder %v650_v24, 0.0  ;;  %v666_v28 = vmul.f32 0.2, %v650_v24  ;;  %v673_v30 = vsel %vm657_vm15, %v649_v16, %v665_v23 }
 0x3c0   :  { %vm656_vm3 = vcmp.gt.f32.partialorder %v648_v27, 0.0  ;;  %v664_v29 = vmul.f32 0.2, %v648_v27  ;;  %v671_v32 = vsel %vm655_vm1, %v647_v20, %v663_v26 }
 0x3c1   :  { %v674_v31 = vsel %vm658_vm2, %v650_v24, %v666_v28 }
 0x3c2   :  { %v672_v33 = vsel %vm656_vm3, %v648_v27, %v664_v29  ;;  %v687_v34 = vpack.c.bf16 %v674_v31, %v673_v30 }
 0x3c3   :  { %v686_v36 = vpack.c.bf16 %v672_v33, %v671_v32 }
 0x3c5   :  { %1297 = vmatprep.mubr.msk.bf16.mxu0 %vm115_vm0, %v686_v36 }
 0x3c6   :  { %1298 = vmatmul.mubr.msk.bf16.gmra.mrb[24].mxu0 %vm115_vm0, %v687_v34 }
 0x491   :  { %v1295_v38 = vpop.f32.mrb[20].mxu0 }
 0x492   :  { %v893_v39 = vadd.f32 %v1295_v38, %v1122_v37  ;;  %v856_v40 = vpop.f32.mrb[21].mxu0 }
 0x493   :  { %v891_v41 = vadd.f32 %v1122_v37, %v856_v40  ;;  %v1296_v42 = vpop.f32.mrb[22].mxu0 }
 0x494   :  { %v894_v5 = vadd.f32 %v1296_v42, %v1122_v37  ;;  %v859_v6 = vpop.f32.mrb[23].mxu0  ;;  %v901_v7 = vmax.f32 %v893_v39, 0.0 }
 0x495   :  { %v892_v43 = vadd.f32 %v1122_v37, %v859_v6  ;;  %v899_v45 = vmax.f32 %v891_v41, 0.0 }
 0x496   :  { %v902_v44 = vmax.f32 %v894_v5, 0.0 }
 0x497   :  { %v900_v46 = vmax.f32 %v892_v43, 0.0 }
 0x498   :  { %v916_v47 = vpack.c.bf16 %v902_v44, %v901_v7 }
 0x499   :  { %v915_v48 = vpack.c.bf16 %v900_v46, %v899_v45  ;;  %v1299_v49 = vpop.f32.mrb[24].mxu0 }
 0x49a   :  { %v897_v50 = vadd.f32 %v1299_v49, %v1122_v37  ;;  %v872_v51 = vpop.f32.mrb[25].mxu0 }
 0x49b   :  { %v895_v52 = vadd.f32 %v1122_v37, %v872_v51  ;;  %v1300_v53 = vpop.f32.mrb[26].mxu0  ;;  %1309 = vmatprep.mubr.msk.bf16.mxu1 %vm115_vm0, %v915_v48 }
 0x49c   :  { %v898_v54 = vadd.f32 %v1300_v53, %v1122_v37  ;;  %v875_v55 = vpop.f32.mrb[27].mxu0  ;;  %1310 = vmatmul.mubr.msk.bf16.vlgmr.msra.gmra.mrb[28].mxu1 %vm115_vm0, %v916_v47  ;;  %v905_v57 = vmax.f32 %v897_v50, 0.0 }
 0x49d   :  { %v896_v56 = vadd.f32 %v1122_v37, %v875_v55  ;;  %v903_v59 = vmax.f32 %v895_v52, 0.0 }
 0x49e   :  { %v906_v58 = vmax.f32 %v898_v54, 0.0 }
 0x49f   :  { %v904_v60 = vmax.f32 %v896_v56, 0.0 }
 0x4a0   :  { %v918_v61 = vpack.c.bf16 %v906_v58, %v905_v57 }
 0x4a1   :  { %v917_v62 = vpack.c.bf16 %v904_v60, %v903_v59 }
 0x4a3   :  { %1313 = vmatprep.mubr.msk.bf16.mxu1 %vm115_vm0, %v917_v62 }
 0x4a4   :  { %1314 = vmatmul.mubr.msk.bf16.gmra.mrb[32].mxu1 %vm115_vm0, %v918_v61 }
 0x56f   :  { %v1311_v63 = vpop.f32.mrb[28].mxu1 }
 0x570   :  { %1023 = vst.msk [vmem:[%s1654_s6 + $0x10] sm:$0xff] %vm1020_vm4, %v1311_v63  ;;  %v989_v0 = vpop.f32.mrb[29].mxu1 }
 0x571   :  { %1021 = vst.msk [vmem:[%s1654_s6] sm:$0xff] %vm1020_vm4, %v989_v0  ;;  %v1312_v1 = vpop.f32.mrb[30].mxu1 }
 0x572   :  { %1024 = vst.msk [vmem:[%s1654_s6 + $0x18] sm:$0xff] %vm1020_vm4, %v1312_v1  ;;  %v992_v2 = vpop.f32.mrb[31].mxu1 }
 0x573   :  { %1022 = vst.msk [vmem:[%s1654_s6 + $0x8] sm:$0xff] %vm1020_vm4, %v992_v2 }
 0x577   :  { %v1315_v4 = vpop.f32.mrb[32].mxu1 }
 0x578   :  { %1027 = vst.msk [vmem:[%s1654_s6 + $0x30] sm:$0xff] %vm1020_vm4, %v1315_v4  ;;  %v1005_v8 = vpop.f32.mrb[33].mxu1 }
 0x579   :  { %1025 = vst.msk [vmem:[%s1654_s6 + $0x20] sm:$0xff] %vm1020_vm4, %v1005_v8  ;;  %v1316_v9 = vpop.f32.mrb[34].mxu1 }
 0x57a   :  { %1028 = vst.msk [vmem:[%s1654_s6 + $0x38] sm:$0xff] %vm1020_vm4, %v1316_v9  ;;  %v1008_v10 = vpop.f32.mrb[35].mxu1 }
 0x57b   :  { %1026 = vst.msk [vmem:[%s1654_s6 + $0x28] sm:$0xff] %vm1020_vm4, %v1008_v10 }

</bundles_post_ra>
